<compile_context>
chip_gen: v6e
topology: v6e:2x2x1
jax: 0.10.0
libtpu: 0.0.40
codegen_flags: <defaults>
</compile_context>

<pallas_src>
import math
import numpy as np
import jax
import jax.numpy as jnp
from jax import lax
from jax.experimental import pallas as pl
from jax.experimental.pallas import tpu as pltpu

# ----------------------------- config -----------------------------
B = 2                         # batch
N = 8                         # sequence length
HIDDEN = 32                   # config.hidden_size
LAYER_NORM_EPS = 1e-7         # config.layer_norm_eps (DeBERTa-v2 default)
_INV_SQRT2 = 1.0 / math.sqrt(2.0)


def _exact_gelu(x):
    # gelu(x) = 0.5 * x * (1 + erf(x / sqrt(2)))
    # erf via Abramowitz–Stegun 7.1.26 (max abs err ~1.5e-7): exp + FMAs only.
    z = x * _INV_SQRT2
    a = jnp.abs(z)
    t = 1.0 / (1.0 + 0.3275911 * a)
    poly = t * (0.254829592 + t * (-0.284496736 + t * (1.421413741
               + t * (-1.453152027 + t * 1.061405429))))
    erf_abs = 1.0 - poly * jnp.exp(-(a * a))
    erf_z = jnp.where(z >= 0.0, erf_abs, -erf_abs)
    return 0.5 * x * (1.0 + erf_z)


# ------------------------- fused kernel ----------------------------
def _head_transform_kernel(x_ref, w_ref, p_ref, o_ref):
    # p_ref rows: 0 = dense bias, 1 = LayerNorm gamma, 2 = LayerNorm beta
    bias = p_ref[0:1, :]
    gamma = p_ref[1:2, :]
    beta = p_ref[2:3, :]

    # dense: h = x @ W + b   (W stored [in, out], i.e. torch weight transposed)
    h = (jnp.dot(x_ref[...], w_ref[...], preferred_element_type=jnp.float32)
         + bias)
    # activation (exact erf gelu, matching torch's default "gelu")
    act = _exact_gelu(h)

    # LayerNorm over hidden (last / lane) axis — single-pass statistics,
    # biased variance like torch.nn.LayerNorm, all stats in f32.
    inv_h = 1.0 / act.shape[-1]
    s1 = jnp.sum(act, axis=-1, keepdims=True)
    s2 = jnp.sum(act * act, axis=-1, keepdims=True)
    mean = s1 * inv_h
    var = jnp.maximum(s2 * inv_h - mean * mean, 0.0)
    inv = lax.rsqrt(var + LAYER_NORM_EPS)
    o_ref[...] = ((act - mean) * inv * gamma + beta).astype(o_ref.dtype)


# --------------------------- wrapper -------------------------------
def prediction_head_transform(hidden_states, W, b, gamma, beta, *, row_tile=512):
    """hidden_states: (B, L, H); W: (H_in, H_out) = torch weight transposed."""
    Bx, L, H = hidden_states.shape
    M = Bx * L
    x2 = hidden_states.reshape(M, H)                 # lane-dense [rows, hidden]
    # One coalesced parameter slab -> a single DMA instead of three tiny ones.
    params = jnp.stack([b, gamma, beta], axis=0)     # (3, H)

    if M <= row_tile:
        # Small problem: gridless call, everything resident in VMEM, no
        # pipeline-loop / double-buffering overhead.
        out = pl.pallas_call(
            _head_transform_kernel,
            out_shape=jax.ShapeDtypeStruct((M, H), jnp.float32),
            in_specs=[
                pl.BlockSpec(memory_space=pltpu.MemorySpace.VMEM),   # x
                pl.BlockSpec(memory_space=pltpu.MemorySpace.VMEM),   # W
                pl.BlockSpec(memory_space=pltpu.MemorySpace.VMEM),   # [b;gamma;beta]
            ],
            out_specs=pl.BlockSpec(memory_space=pltpu.MemorySpace.VMEM),
        )(x2, W, params)
    else:
        # Real-size path: tile over rows; W / params are grid-invariant and
        # stay resident.  Row axis is independent -> "parallel" (2 TCs on v7x).
        # TODO(synk): at real DeBERTa sizes, also consider bf16 I/O and fusing
        # this transform into the adjacent decoder matmul instead of a
        # standalone launch.
        grid = (pl.cdiv(M, row_tile),)
        out = pl.pallas_call(
            _head_transform_kernel,
            out_shape=jax.ShapeDtypeStruct((M, H), jnp.float32),
            grid=grid,
            in_specs=[
                pl.BlockSpec((row_tile, H), lambda i: (i, 0)),   # x row tile
                pl.BlockSpec((H, H), lambda i: (0, 0)),          # W (resident)
                pl.BlockSpec((3, H), lambda i: (0, 0)),          # params (resident)
            ],
            out_specs=pl.BlockSpec((row_tile, H), lambda i: (i, 0)),
            compiler_params=pltpu.CompilerParams(
                dimension_semantics=("parallel",)),
        )(x2, W, params)
    return out.reshape(Bx, L, H)


# ---------------------- pure-JAX reference -------------------------
def reference(hidden_states, W, b, gamma, beta):
    h = hidden_states @ W + b
    act = jax.nn.gelu(h, approximate=False)      # exact (erf) gelu, like torch
    mean = jnp.mean(act, axis=-1, keepdims=True)
    var = jnp.mean((act - mean) ** 2, axis=-1, keepdims=True)
    return (act - mean) * lax.rsqrt(var + LAYER_NORM_EPS) * gamma + beta


# ------------------------------ main -------------------------------
if __name__ == "__main__":
    key = jax.random.PRNGKey(0)
    ks = jax.random.split(key, 5)

    hidden_states = jax.random.normal(ks[0], (B, N, HIDDEN), jnp.float32)
    # torch nn.Linear weight is [out, in]; stored here transposed as [in, out]
    W = jax.random.normal(ks[1], (HIDDEN, HIDDEN), jnp.float32) * 0.05
    b = jax.random.normal(ks[2], (HIDDEN,), jnp.float32) * 0.01
    gamma = 1.0 + 0.1 * jax.random.normal(ks[3], (HIDDEN,), jnp.float32)
    beta = 0.1 * jax.random.normal(ks[4], (HIDDEN,), jnp.float32)

    ref = reference(hidden_states, W, b, gamma, beta)

    # Path 1: gridless, fully-resident VMEM call (the one used at these shapes).
    out = prediction_head_transform(hidden_states, W, b, gamma, beta)
    out = jax.block_until_ready(out)
    np.testing.assert_allclose(np.asarray(out), np.asarray(ref), rtol=1e-4, atol=1e-4)

    # Path 2: row-tiled grid path (exercised here with a tiny tile so both
    # code paths are validated without needing large shapes).
    out_tiled = prediction_head_transform(hidden_states, W, b, gamma, beta,
                                          row_tile=8)
    out_tiled = jax.block_until_ready(out_tiled)
    np.testing.assert_allclose(np.asarray(out_tiled), np.asarray(ref),
                               rtol=1e-4, atol=1e-4)

    print("KERNEL_OK")
</pallas_src>

<mosaic_0001>
module attributes {stable_mosaic.version = 11 : i64} {
  func.func @_head_transform_kernel(%arg0: memref<16x32xf32, #tpu.memory_space<vmem>>, %arg1: memref<32x32xf32, #tpu.memory_space<vmem>>, %arg2: memref<3x32xf32, #tpu.memory_space<vmem>>, %arg3: memref<16x32xf32, #tpu.memory_space<vmem>>) attributes {dimension_semantics = [], scalar_prefetch = 0 : i64, scratch_operands = 0 : i64, tpu.core_type = #tpu.core_type<tc>} {
    %c0 = arith.constant 0 : index
    %c0_0 = arith.constant 0 : index
    %0 = vector.load %arg2[%c0, %c0_0] : memref<3x32xf32, #tpu.memory_space<vmem>>, vector<1x32xf32>
    %c1 = arith.constant 1 : index
    %c0_1 = arith.constant 0 : index
    %1 = vector.load %arg2[%c1, %c0_1] : memref<3x32xf32, #tpu.memory_space<vmem>>, vector<1x32xf32>
    %c2 = arith.constant 2 : index
    %c0_2 = arith.constant 0 : index
    %2 = vector.load %arg2[%c2, %c0_2] : memref<3x32xf32, #tpu.memory_space<vmem>>, vector<1x32xf32>
    %c0_3 = arith.constant 0 : index
    %c0_4 = arith.constant 0 : index
    %3 = vector.load %arg0[%c0_3, %c0_4] : memref<16x32xf32, #tpu.memory_space<vmem>>, vector<16x32xf32>
    %c0_5 = arith.constant 0 : index
    %c0_6 = arith.constant 0 : index
    %4 = vector.load %arg1[%c0_5, %c0_6] : memref<32x32xf32, #tpu.memory_space<vmem>>, vector<32x32xf32>
    %cst = arith.constant dense<0.000000e+00> : vector<16x32xf32>
    %5 = tpu.matmul %3, %4, %cst {dimension_numbers = #tpu.dot_dimension_numbers<[1], [0], [0], [1], [0, 0, 1, 1], [], []>} : vector<16x32xf32>, vector<32x32xf32>, vector<16x32xf32> -> vector<16x32xf32>
    %6 = vector.broadcast %0 : vector<1x32xf32> to vector<16x32xf32>
    %7 = arith.addf %5, %6 : vector<16x32xf32>
    %cst_7 = arith.constant 0.707106769 : f32
    %8 = vector.broadcast %cst_7 : f32 to vector<16x32xf32>
    %9 = arith.mulf %7, %8 : vector<16x32xf32>
    %10 = math.absf %9 : vector<16x32xf32>
    %cst_8 = arith.constant 0.327591091 : f32
    %11 = vector.broadcast %cst_8 : f32 to vector<16x32xf32>
    %12 = arith.mulf %11, %10 : vector<16x32xf32>
    %cst_9 = arith.constant 1.000000e+00 : f32
    %13 = vector.broadcast %cst_9 : f32 to vector<16x32xf32>
    %14 = arith.addf %13, %12 : vector<16x32xf32>
    %cst_10 = arith.constant 1.000000e+00 : f32
    %15 = vector.broadcast %cst_10 : f32 to vector<16x32xf32>
    %16 = arith.divf %15, %14 : vector<16x32xf32>
    %cst_11 = arith.constant 1.06140542 : f32
    %17 = vector.broadcast %cst_11 : f32 to vector<16x32xf32>
    %18 = arith.mulf %16, %17 : vector<16x32xf32>
    %cst_12 = arith.constant -1.45315206 : f32
    %19 = vector.broadcast %cst_12 : f32 to vector<16x32xf32>
    %20 = arith.addf %19, %18 : vector<16x32xf32>
    %21 = arith.mulf %16, %20 : vector<16x32xf32>
    %cst_13 = arith.constant 1.42141378 : f32
    %22 = vector.broadcast %cst_13 : f32 to vector<16x32xf32>
    %23 = arith.addf %22, %21 : vector<16x32xf32>
    %24 = arith.mulf %16, %23 : vector<16x32xf32>
    %cst_14 = arith.constant -0.284496725 : f32
    %25 = vector.broadcast %cst_14 : f32 to vector<16x32xf32>
    %26 = arith.addf %25, %24 : vector<16x32xf32>
    %27 = arith.mulf %16, %26 : vector<16x32xf32>
    %cst_15 = arith.constant 0.254829586 : f32
    %28 = vector.broadcast %cst_15 : f32 to vector<16x32xf32>
    %29 = arith.addf %28, %27 : vector<16x32xf32>
    %30 = arith.mulf %16, %29 : vector<16x32xf32>
    %31 = arith.mulf %10, %10 : vector<16x32xf32>
    %cst_16 = arith.constant 0.000000e+00 : f32
    %32 = vector.broadcast %cst_16 : f32 to vector<16x32xf32>
    %33 = arith.subf %32, %31 : vector<16x32xf32>
    %34 = math.exp %33 : vector<16x32xf32>
    %35 = arith.mulf %30, %34 : vector<16x32xf32>
    %cst_17 = arith.constant 1.000000e+00 : f32
    %36 = vector.broadcast %cst_17 : f32 to vector<16x32xf32>
    %37 = arith.subf %36, %35 : vector<16x32xf32>
    %cst_18 = arith.constant 0.000000e+00 : f32
    %38 = vector.broadcast %cst_18 : f32 to vector<16x32xf32>
    %39 = arith.cmpf oge, %9, %38 : vector<16x32xf32>
    %cst_19 = arith.constant 0.000000e+00 : f32
    %40 = vector.broadcast %cst_19 : f32 to vector<16x32xf32>
    %41 = arith.subf %40, %37 : vector<16x32xf32>
    %42 = arith.select %39, %37, %41 : vector<16x32xi1>, vector<16x32xf32>
    %cst_20 = arith.constant 5.000000e-01 : f32
    %43 = vector.broadcast %cst_20 : f32 to vector<16x32xf32>
    %44 = arith.mulf %43, %7 : vector<16x32xf32>
    %cst_21 = arith.constant 1.000000e+00 : f32
    %45 = vector.broadcast %cst_21 : f32 to vector<16x32xf32>
    %46 = arith.addf %45, %42 : vector<16x32xf32>
    %47 = arith.mulf %44, %46 : vector<16x32xf32>
    %cst_22 = arith.constant dense<0.000000e+00> : vector<16xf32>
    %48 = vector.multi_reduction <add>, %47, %cst_22 [1] : vector<16x32xf32> to vector<16xf32>
    %49 = vector.shape_cast %48 : vector<16xf32> to vector<16x1xf32>
    %50 = arith.mulf %47, %47 : vector<16x32xf32>
    %cst_23 = arith.constant dense<0.000000e+00> : vector<16xf32>
    %51 = vector.multi_reduction <add>, %50, %cst_23 [1] : vector<16x32xf32> to vector<16xf32>
    %52 = vector.shape_cast %51 : vector<16xf32> to vector<16x1xf32>
    %cst_24 = arith.constant 3.125000e-02 : f32
    %53 = vector.broadcast %cst_24 : f32 to vector<16x1xf32>
    %54 = arith.mulf %49, %53 : vector<16x1xf32>
    %cst_25 = arith.constant 3.125000e-02 : f32
    %55 = vector.broadcast %cst_25 : f32 to vector<16x1xf32>
    %56 = arith.mulf %52, %55 : vector<16x1xf32>
    %57 = arith.mulf %54, %54 : vector<16x1xf32>
    %58 = arith.subf %56, %57 : vector<16x1xf32>
    %cst_26 = arith.constant 0.000000e+00 : f32
    %59 = vector.broadcast %cst_26 : f32 to vector<16x1xf32>
    %60 = arith.maximumf %58, %59 : vector<16x1xf32>
    %cst_27 = arith.constant 1.000000e-07 : f32
    %61 = vector.broadcast %cst_27 : f32 to vector<16x1xf32>
    %62 = arith.addf %60, %61 : vector<16x1xf32>
    %63 = math.rsqrt %62 : vector<16x1xf32>
    %64 = vector.broadcast %54 : vector<16x1xf32> to vector<16x32xf32>
    %65 = arith.subf %47, %64 : vector<16x32xf32>
    %66 = vector.broadcast %63 : vector<16x1xf32> to vector<16x32xf32>
    %67 = arith.mulf %65, %66 : vector<16x32xf32>
    %68 = vector.broadcast %1 : vector<1x32xf32> to vector<16x32xf32>
    %69 = arith.mulf %67, %68 : vector<16x32xf32>
    %70 = vector.broadcast %2 : vector<1x32xf32> to vector<16x32xf32>
    %71 = arith.addf %69, %70 : vector<16x32xf32>
    %c0_28 = arith.constant 0 : index
    %c0_29 = arith.constant 0 : index
    %72 = vector.load %arg3[%c0_28, %c0_29] : memref<16x32xf32, #tpu.memory_space<vmem>>, vector<16x32xf32>
    tpu.vector_store %arg3[%c0_28, %c0_29], %71 {strides = array<i32>} : memref<16x32xf32, #tpu.memory_space<vmem>>, vector<16x32xf32>,
    return
  }
}

</mosaic_0001>

<bundles_post_ra>
// kernel: tpu_custom_call.1
= control target key start
LH: loop header
LB: loop body
LE: loop exit
PB: predicated region body
PF: predicated region fallthrough
CT: control target
= control target key end

     0   :  { %8 = vsyncpa [#allocation3], 0  ;;  %s448_s0 = inlined_call_operand.hbm [shape: f32[16,32], index: 0, kind: input, shape index: {}]   ;;  %s449_s1 = inlined_call_operand.hbm [shape: f32[32,32], index: 1, kind: input, shape index: {}]   ;;  %s450_s2 = inlined_call_operand.hbm [shape: f32[3,32], index: 2, kind: input, shape index: {}]   ;;  %s451_s3 = inlined_call_operand.hbm [shape: f32[16,32], index: 3, kind: output, shape index: {}]  }
   0x1   :  { %9 = vsyncpa [#allocation6], 0 }
   0x2   :  { %10 = vsyncpa [#allocation4], 0  ;;  %s393_s12 = smov [#allocation5]   ;;  %s394_s14 = smov [#allocation2]  }
   0x3   :  { %s28_s13 = sshll.u32 %s393_s12, 4  ;;  %s16_s15 = sshll.u32 %s394_s14, 4  ;;  %s29_s13 = int_to_ptr.vmem [resolvable:$true] %s28_s13  ;;  %s17_s15 = int_to_ptr.vmem [resolvable:$true] %s16_s15 }
   0x4   :  { %s315_s16 = scalar_lea.vmem %s29_s13, 512  ;;  %p320_p1 = scmp.lt.s32.totalorder %s29_s13, %s29_s13 }
   0x5   :  { %p316_p0 = scmp.ne.s32.totalorder %s29_s13, %s315_s16  ;;  %p321_p2 = scmp.lt.s32.totalorder %s315_s16, %s315_s16 }
   0x7   :  { %p322_p3 = por %p321_p2, %p320_p1 }
   0x9   :  { %p323_p4 = pnand %p322_p3, %p316_p0 }
   0xb   :  { %326 = shalt.err (!%p323_p4)
}
   0xc   :  { %s395_s17 = smov 128   ;;  %s396_s18 = smov 8  }
   0xd   :  { %34 = dma.hbm_to_vmem [thread:$0]  %s449_s1, 512, %s29_s13, [#allocation6], %s395_s17, %s395_s17, %s396_s18  }
   0xe   :  { %s335_s21 = scalar_lea.vmem %s17_s15, 256  ;;  %p340_p6 = scmp.lt.s32.totalorder %s17_s15, %s17_s15 }
   0xf   :  { %p336_p5 = scmp.ne.s32.totalorder %s17_s15, %s335_s21  ;;  %p341_p7 = scmp.lt.s32.totalorder %s335_s21, %s335_s21 }
  0x11   :  { %p342_p8 = por %p341_p7, %p340_p6 }
  0x13   :  { %p343_p9 = pnand %p342_p8, %p336_p5 }
  0x15   :  { %346 = shalt.err (!%p343_p9)
}
  0x16   :  { %22 = dma.hbm_to_vmem [thread:$0]  %s448_s0, 256, %s17_s15, [#allocation3], %s395_s17, %s395_s17, %s396_s18  }
  0x17   :  { %s397_s24 = smov [#allocation7]  }
  0x18   :  { %s41_s25 = sshll.u32 %s397_s24, 4  ;;  %s42_s25 = int_to_ptr.vmem [resolvable:$true] %s41_s25 }
  0x19   :  { %s355_s26 = scalar_lea.vmem %s42_s25, 64  ;;  %p360_p11 = scmp.lt.s32.totalorder %s42_s25, %s42_s25 }
  0x1a   :  { %p356_p10 = scmp.ne.s32.totalorder %s42_s25, %s355_s26  ;;  %p361_p12 = scmp.lt.s32.totalorder %s355_s26, %s355_s26 }
  0x1c   :  { %p362_p13 = por %p361_p12, %p360_p11 }
  0x1e   :  { %p363_p0 = pnand %p362_p13, %p356_p10 }
  0x20   :  { %366 = shalt.err (!%p363_p0)
}
  0x21   :  { %44 = dma.hbm_to_vmem [thread:$0]  %s450_s2, 64, %s42_s25, [#allocation6]  }
  0x22   :  { %387 = dma.done.wait [#allocation3], 256  }
  0x23   :  { %388 = vsyncadd [#allocation3], 4294967040 }
  0x24   :  { %389 = dma.done.wait [#allocation6], 576  }
  0x25   :  { %390 = vsyncadd [#allocation6], 4294966720  ;;  %vm67_vm0 = vcmask 261120   ;;  %v62_v0 = vld [vmem:[#allocation5 + $0x18] sm:$0xff]  ;;  %v61_v1 = vld [vmem:[#allocation5 + $0x10] sm:$0xff]  ;;  %s398_s0 = smov [#allocation8]  }
  0x26   :  { %278 = vmatprep.subr.mxu0 %v62_v0  ;;  %v57_v2 = vld [vmem:[#allocation2] sm:$0xff]  ;;  %v60_v3 = vld [vmem:[#allocation5 + $0x8] sm:$0xff]  ;;  %v59_v4 = vld [vmem:[#allocation5] sm:$0xff]  ;;  %s254_s2 = sshll.u32 %s398_s0, 4  ;;  %s255_s2 = int_to_ptr.vmem [resolvable:$true] %s254_s2 }
  0x27   :  { %279 = vmatpush3.msra.mxu0 %v62_v0  ;;  %286 = vmatprep.mubr.msk.f32.mxu0 %vm67_vm0, %v57_v2  ;;  %v58_v5 = vld [vmem:[#allocation2 + $0x8] sm:$0xff]  ;;  %v267_v6 = vld [vmem:[#allocation7] ss:$0 sm:$0xff]  ;;  %s367_s28 = scalar_lea.vmem %s255_s2, 256  ;;  %p372_p2 = scmp.lt.s32.totalorder %s255_s2, %s255_s2 }
  0x28   :  { %280 = vmatprep.subr.mxu0 %v61_v1  ;;  %p368_p1 = scmp.ne.s32.totalorder %s255_s2, %s367_s28  ;;  %p373_p3 = scmp.lt.s32.totalorder %s367_s28, %s367_s28 }
  0x29   :  { %281 = vmatpush3.msra.mxu0 %v61_v1 }
  0x2a   :  { %282 = vmatprep.subr.mxu0 %v60_v3  ;;  %p374_p4 = por %p373_p3, %p372_p2 }
  0x2b   :  { %283 = vmatpush3.msra.mxu0 %v60_v3 }
  0x2c   :  { %284 = vmatprep.subr.mxu0 %v59_v4  ;;  %p375_p5 = pnand %p374_p4, %p368_p1 }
  0x2d   :  { %285 = vmatpush3.msra.mxu0 %v59_v4 }
  0x2e   :  { %287 = vmatmul.mubr.msk.f32.vlgmr.msra.gmra.mxu0 %vm67_vm0, %v58_v5 }
  0xee   :  { %v288_v7 = vpop.f32.mrf.mxu0 }
  0xef   :  { %v146_v8 = vadd.f32 %v288_v7, %v267_v6 }
  0xf0   :  { %v140_v9 = vpop.f32.mrf.mxu0 }
  0xf1   :  { %v150_v10 = vmul.f32 0.70710677, %v146_v8  ;;  %v141_v11 = vadd.f32 %v267_v6, %v140_v9  ;;  %v198_v56 = vmul.f32 0.5, %v146_v8 }
  0xf3   :  { %v152_v12 = vand.u32 2147483647, %v150_v10  ;;  %v149_v13 = vmul.f32 0.70710677, %v141_v11  ;;  %vm192_vm1 = vcmp.ge.f32.partialorder %v150_v10, 0.0  ;;  %v197_v57 = vmul.f32 0.5, %v141_v11 }
  0xf5   :  { %v154_v14 = vmul.f32 0.3275911, %v152_v12  ;;  %v151_v15 = vand.u32 2147483647, %v149_v13  ;;  %v180_v19 = vmul.f32 %v152_v12, %v152_v12  ;;  %vm191_vm2 = vcmp.ge.f32.partialorder %v149_v13, 0.0 }
  0xf7   :  { %v156_v16 = vadd.f32 1.0, %v154_v14  ;;  %v153_v17 = vmul.f32 0.3275911, %v151_v15  ;;  %v179_v20 = vmul.f32 %v151_v15, %v151_v15  ;;  %v182_v21 = vsub.f32 0.0, %v180_v19 }
  0xf9   :  { %295 = vrcp.f32 %v156_v16  ;;  %v155_v18 = vadd.f32 1.0, %v153_v17  ;;  %v181_v23 = vsub.f32 0.0, %v179_v20  ;;  %v185_v25 = vmul.f32 1.442695, %v182_v21  ;;  %v270_v21 = vld [vmem:[#allocation7 + $0x1] ss:$0 sm:$0xff] }
  0xfb   :  { %297 = vrcp.f32 %v155_v18  ;;  %v183_v28 = vmul.f32 1.442695, %v181_v23  ;;  %v271_v23 = vld [vmem:[#allocation7 + $0x2] ss:$0 sm:$0xff] }
  0xfc   :  { %299 = vpow2.f32 %v185_v25 }
  0xfd   :  { %301 = vpow2.f32 %v183_v28 }
 0x106   :  { %v296_v22 = vpop.eup %295 }
 0x107   :  { %v162_v24 = vmul.f32 1.0614054, %v296_v22 }
 0x108   :  { %v298_v26 = vpop.eup %297 }
 0x109   :  { %v164_v27 = vadd.f32 -1.4531521, %v162_v24  ;;  %v161_v29 = vmul.f32 1.0614054, %v298_v26  ;;  %v300_v43 = vpop.eup %299 }
 0x10a   :  { %v302_v47 = vpop.eup %301 }
 0x10b   :  { %v166_v30 = vmul.f32 %v296_v22, %v164_v27  ;;  %v163_v31 = vadd.f32 -1.4531521, %v161_v29 }
 0x10d   :  { %v168_v32 = vadd.f32 1.4214138, %v166_v30  ;;  %v165_v33 = vmul.f32 %v298_v26, %v163_v31 }
 0x10f   :  { %v170_v34 = vmul.f32 %v296_v22, %v168_v32  ;;  %v167_v35 = vadd.f32 1.4214138, %v165_v33 }
 0x111   :  { %v172_v36 = vadd.f32 -0.28449672, %v170_v34  ;;  %v169_v37 = vmul.f32 %v298_v26, %v167_v35 }
 0x113   :  { %v174_v38 = vmul.f32 %v296_v22, %v172_v36  ;;  %v171_v39 = vadd.f32 -0.28449672, %v169_v37 }
 0x115   :  { %v176_v40 = vadd.f32 0.2548296, %v174_v38  ;;  %v173_v41 = vmul.f32 %v298_v26, %v171_v39 }
 0x117   :  { %v178_v42 = vmul.f32 %v296_v22, %v176_v40  ;;  %v175_v44 = vadd.f32 0.2548296, %v173_v41 }
 0x119   :  { %v188_v45 = vmul.f32 %v300_v43, %v178_v42  ;;  %v177_v46 = vmul.f32 %v298_v26, %v175_v44 }
 0x11b   :  { %v190_v48 = vsub.f32 1.0, %v188_v45  ;;  %v187_v49 = vmul.f32 %v302_v47, %v177_v46 }
 0x11d   :  { %v194_v50 = vsub.f32 0.0, %v190_v48  ;;  %v189_v51 = vsub.f32 1.0, %v187_v49 }
 0x11f   :  { %v196_v52 = vsel %vm192_vm1, %v190_v48, %v194_v50  ;;  %v193_v53 = vsub.f32 0.0, %v189_v51 }
 0x120   :  { %v200_v54 = vadd.f32 1.0, %v196_v52 }
 0x121   :  { %v195_v55 = vsel %vm191_vm2, %v189_v51, %v193_v53 }
 0x122   :  { %v199_v58 = vadd.f32 1.0, %v195_v55  ;;  %v202_v59 = vmul.f32 %v200_v54, %v198_v56 }
 0x124   :  { %v201_v60 = vmul.f32 %v199_v58, %v197_v57  ;;  %v210_v0 = vmul.f32 %v202_v59, %v202_v59  ;;  %v206_v1 = vsel %vm67_vm0, %v202_v59, 0.0 }
 0x126   :  { %v203_v61 = vsel %vm67_vm0, %v201_v60, 0.0  ;;  %v209_v62 = vmul.f32 %v201_v60, %v201_v60  ;;  %v214_v2 = vsel %vm67_vm0, %v210_v0, 0.0 }
 0x127   :  { %204 = vadd.xlane.f32.xlu0 %v203_v61 }
 0x128   :  { %v211_v63 = vsel %vm67_vm0, %v209_v62, 0.0 }
 0x129   :  { %212 = vadd.xlane.f32.xlu1 %v211_v63 }
 0x12b   :  { %207 = vadd.xlane.f32.xlu0 %v206_v1 }
 0x12d   :  { %215 = vadd.xlane.f32.xlu1 %v214_v2 }
 0x1b0   :  { %v205_v3 = vpop.xlane.xlu0 %204 }
 0x1b1   :  { %v217_v4 = vmul.f32 0.03125, %v205_v3 }
 0x1b2   :  { %v213_v5 = vpop.xlane.xlu1 %212 }
 0x1b3   :  { %v221_v6 = vmul.f32 %v217_v4, %v217_v4  ;;  %v219_v7 = vmul.f32 0.03125, %v213_v5  ;;  %v231_v19 = vsub.f32 %v201_v60, %v217_v4 }
 0x1b4   :  { %v208_v8 = vpop.xlane.xlu0 %207 }
 0x1b5   :  { %v223_v9 = vsub.f32 %v219_v7, %v221_v6  ;;  %v218_v10 = vmul.f32 0.03125, %v208_v8 }
 0x1b6   :  { %v216_v11 = vpop.xlane.xlu1 %215 }
 0x1b7   :  { %v225_v12 = vmax.f32 %v223_v9, 0.0  ;;  %v222_v13 = vmul.f32 %v218_v10, %v218_v10  ;;  %v220_v14 = vmul.f32 0.03125, %v216_v11  ;;  %v232_v24 = vsub.f32 %v202_v59, %v218_v10 }
 0x1b9   :  { %v227_v15 = vadd.f32 1e-07, %v225_v12  ;;  %v224_v16 = vsub.f32 %v220_v14, %v222_v13 }
 0x1bb   :  { %303 = vrsqrt.f32 %v227_v15  ;;  %v226_v17 = vmax.f32 %v224_v16, 0.0 }
 0x1bd   :  { %v228_v18 = vadd.f32 1e-07, %v226_v17 }
 0x1bf   :  { %305 = vrsqrt.f32 %v228_v18 }
 0x1c8   :  { %v304_v20 = vpop.eup %303 }
 0x1c9   :  { %v233_v22 = vmul.f32 %v304_v20, %v231_v19 }
 0x1cb   :  { %v239_v25 = vmul.f32 %v270_v21, %v233_v22 }
 0x1cc   :  { %v306_v26 = vpop.eup %305 }
 0x1cd   :  { %v234_v27 = vmul.f32 %v306_v26, %v232_v24  ;;  %v245_v28 = vadd.f32 %v271_v23, %v239_v25 }
 0x1cf   :  { %v240_v29 = vmul.f32 %v270_v21, %v234_v27  ;;  %247 = vst.msk [vmem:[#allocation8] sm:$0xff] %vm67_vm0, %v245_v28 }
 0x1d1   :  { %v246_v30 = vadd.f32 %v271_v23, %v240_v29 }
 0x1d3   :  { %248 = vst.msk [vmem:[#allocation8 + $0x8] sm:$0xff] %vm67_vm0, %v246_v30 }
 0x1d4   :  { %378 = shalt.err (!%p375_p5)
}
 0x1d5   :  { %260 = dma.vmem_to_hbm [thread:$0]  %s255_s2, 256, %s451_s3, [#allocation4], %s395_s17, %s395_s17, %s396_s18  }
 0x1d6   :  { %391 = dma.done.wait [#allocation4], 256  }
 0x1d7   :  { %392 = vsyncadd [#allocation4], 4294967040 }
 0x1d8   :  { %264 = vsyncpa [#allocation3], 1 }
 0x1d9   :  { %265 = vsyncpa [#allocation6], 1 }
 0x1da   :  { %266 = vsyncpa [#allocation4], 1 }

</bundles_post_ra>
